<compile_context>
chip_gen: v6e
topology: v6e:2x2x1
jax: 0.10.0
libtpu: 0.0.40
codegen_flags: <defaults>
</compile_context>

<pallas_src>
import functools

import jax
import jax.numpy as jnp
from jax.experimental import pallas as pl
from jax.experimental.pallas import tpu as pltpu

EPS = 1e-5


def _conv_block_kernel(seed_ref, x_ref, mask_ref, s1_ref, b1_ref, w1_ref,
                       s2_ref, b2_ref, w2_ref, o_ref, *, W, L,
                       drop_rate, drop_threshold, mm_dtype):
    """Fused ConvBlock over a batch tile folded into the lane axis.

    x_ref:    (Cin, L)         activations; channels on sublanes, L = B_tile*H*W lanes
    mask_ref: (9, L)           per-tap validity mask (1.0 inside image, 0.0 at pad)
    s*/b*:    (C, 1)           folded eval-mode BatchNorm scale / shift
    w1_ref:   (Cmid, Cin)      1x1 conv weight
    w2_ref:   (9, Cout, Cmid)  3x3 conv weight, tap-major (k = dh*3 + dw)
    o_ref:    (Cout, L)        lane-dense output
    """
    # bn1 -> relu -> conv1(1x1, MXU) -> bn2 -> relu; never leaves VMEM/registers.
    a = jnp.maximum(x_ref[...] * s1_ref[...] + b1_ref[...], 0.0)           # (Cin, L), f32 VPU
    mid = jnp.dot(w1_ref[...], a.astype(mm_dtype),
                  preferred_element_type=jnp.float32)                      # (Cmid, L)
    mid = jnp.maximum(mid * s2_ref[...] + b2_ref[...], 0.0)                # f32 VPU

    # conv2 (3x3, pad=1): nine accumulating matmuls.  Each tap input is an XLU
    # lane-rotation of `mid` (no padded scratch, no im2col stores); boundary
    # handling is a per-column mask applied to the small (Cout, L) contribution.
    acc = jnp.dot(w2_ref[4], mid.astype(mm_dtype),
                  preferred_element_type=jnp.float32)                      # center tap, no mask
    for dh in range(3):
        for dw in range(3):
            k = dh * 3 + dw
            if k == 4:
                continue
            off = (dh - 1) * W + (dw - 1)             # lane offset of the source pixel
            t = pltpu.roll(mid, (-off) % L, axis=1).astype(mm_dtype)
            c = jnp.dot(w2_ref[k], t, preferred_element_type=jnp.float32)  # (Cout, L)
            acc = acc + c * mask_ref[k:k + 1, :]
    out = acc

    if drop_rate > 0.0:
        # F.dropout default (training=True): always applied.  The 1/(1-p) scale
        # is folded into w2 in the wrapper; here it is a raw uint32 threshold test.
        # TODO(synk): eval-mode gating (module.training) must be handled by the caller.
        pltpu.prng_seed(seed_ref[0] + pl.program_id(0))
        bits = pltpu.bitcast(pltpu.prng_random_bits(out.shape), jnp.uint32)
        out = jnp.where(bits >= jnp.uint32(drop_threshold), out, 0.0)

    o_ref[...] = out


def conv_block_forward(inputs, params, drop_rate=0.0, seed=0,
                       matmul_dtype=jnp.float32):
    """Pallas implementation of ConvBlock.forward(list_of_NCHW_tensors)."""
    # glue: concat along channels (torch.cat(inputs, 1)); stay in NCHW values.
    x = jnp.concatenate(inputs, axis=1).astype(jnp.float32)
    N, Cin, H, W = x.shape
    HW = H * W
    Cmid = params["w1"].shape[0]
    Cout = params["w2"].shape[0]

    # --- batch tiling: 2 grid steps when possible (both v7x TCs busy), else 1 ---
    n_steps = 2 if N >= 2 else 1
    B_tile = pl.cdiv(N, n_steps)
    if n_steps > 1 and (B_tile * HW) % 128 != 0:
        # lane block must be 128-aligned unless it spans the full axis
        n_steps, B_tile = 1, N
    Np = n_steps * B_tile
    L = B_tile * HW
    if Np != N:
        x = jnp.concatenate([x, jnp.zeros((Np - N, Cin, H, W), x.dtype)], axis=0)

    # fold BatchNorm (eval mode) into per-channel scale / shift
    s1 = params["g1"] / jnp.sqrt(params["v1"] + EPS)
    sh1 = params["b1"] - params["m1"] * s1
    s2 = params["g2"] / jnp.sqrt(params["v2"] + EPS)
    sh2 = params["b2"] - params["m2"] * s2

    # lane-folded layout (Cin, Np*HW): one cheap XLA transpose in HBM so every
    # grid step works on a single wide, lane-dense slab.
    x2 = x.reshape(Np, Cin, HW).transpose(1, 0, 2).reshape(Cin, Np * HW)

    w1_mat = params["w1"][:, :, 0, 0].astype(matmul_dtype)                   # (Cmid, Cin)
    # (Cout, Cmid, 3, 3) -> (3, 3, Cout, Cmid) -> (9, Cout, Cmid), tap-major
    w2_taps = jnp.transpose(params["w2"], (2, 3, 0, 1)).reshape(9, Cout, Cmid)
    if drop_rate > 0.0:
        w2_taps = w2_taps * (1.0 / (1.0 - drop_rate))    # fold dropout rescale
    w2_taps = w2_taps.astype(matmul_dtype)

    # per-tap boundary masks, hoisted out of the kernel.  Valid <=> the tap's
    # source pixel lies inside the SAME image, which also guards the batch-fold
    # (and roll wrap-around) boundaries.  Loaded once (constant index_map).
    pix = jnp.arange(L, dtype=jnp.int32) % HW
    hh, ww = pix // W, pix % W
    rows = []
    for dh in range(3):
        rok = jnp.ones((L,), bool) if dh == 1 else (hh >= 1 if dh == 0 else hh <= H - 2)
        for dw in range(3):
            cok = jnp.ones((L,), bool) if dw == 1 else (ww >= 1 if dw == 0 else ww <= W - 2)
            rows.append((rok & cok).astype(jnp.float32))
    masks = jnp.stack(rows)                                                  # (9, L)

    seed_arr = jnp.array([int(seed)], dtype=jnp.int32)
    drop_threshold = min(int(round(float(drop_rate) * 2 ** 32)), 2 ** 32 - 1)

    kernel = functools.partial(_conv_block_kernel, W=W, L=L,
                               drop_rate=float(drop_rate),
                               drop_threshold=drop_threshold,
                               mm_dtype=matmul_dtype)

    out2 = pl.pallas_call(
        kernel,
        out_shape=jax.ShapeDtypeStruct((Cout, Np * HW), jnp.float32),
        grid_spec=pltpu.PrefetchScalarGridSpec(
            num_scalar_prefetch=1,                      # dropout seed in SMEM
            grid=(n_steps,),
            in_specs=[
                pl.BlockSpec((Cin, L), lambda n, s: (0, n)),           # x slab
                pl.BlockSpec((9, L), lambda n, s: (0, 0)),             # tap masks (resident)
                pl.BlockSpec((Cin, 1), lambda n, s: (0, 0)),           # bn1 scale
                pl.BlockSpec((Cin, 1), lambda n, s: (0, 0)),           # bn1 shift
                pl.BlockSpec((Cmid, Cin), lambda n, s: (0, 0)),        # w1
                pl.BlockSpec((Cmid, 1), lambda n, s: (0, 0)),          # bn2 scale
                pl.BlockSpec((Cmid, 1), lambda n, s: (0, 0)),          # bn2 shift
                pl.BlockSpec((9, Cout, Cmid), lambda n, s: (0, 0, 0)), # w2 taps
            ],
            out_specs=pl.BlockSpec((Cout, L), lambda n, s: (0, n)),
        ),
        compiler_params=pltpu.CompilerParams(
            dimension_semantics=("parallel",),          # megacore / 2 TCs on v7x
        ),
    )(seed_arr, x2, masks, s1.reshape(Cin, 1), sh1.reshape(Cin, 1), w1_mat,
      s2.reshape(Cmid, 1), sh2.reshape(Cmid, 1), w2_taps)

    out = out2.reshape(Cout, Np, HW).transpose(1, 0, 2)[:N]
    return out.reshape(N, Cout, H, W)


def reference_forward(inputs, params):
    """Pure-JAX (XLA) reference of the ConvBlock forward (drop_rate == 0)."""
    x = jnp.concatenate(inputs, axis=1)

    def bn(v, g, b, m, var):
        return ((v - m[None, :, None, None])
                / jnp.sqrt(var[None, :, None, None] + EPS)
                * g[None, :, None, None] + b[None, :, None, None])

    a1 = jax.nn.relu(bn(x, params["g1"], params["b1"], params["m1"], params["v1"]))
    c1 = jax.lax.conv_general_dilated(
        a1, params["w1"], (1, 1), "VALID",
        dimension_numbers=("NCHW", "OIHW", "NCHW"))
    a2 = jax.nn.relu(bn(c1, params["g2"], params["b2"], params["m2"], params["v2"]))
    c2 = jax.lax.conv_general_dilated(
        a2, params["w2"], (1, 1), ((1, 1), (1, 1)),
        dimension_numbers=("NCHW", "OIHW", "NCHW"))
    return c2


if __name__ == "__main__":
    key = jax.random.PRNGKey(0)
    N, H, W = 2, 16, 16
    growthrate, bn_size = 8, 4          # ConvBlock(in_features=16, growthrate=8, bn_size=4, drop_rate=0.0)
    c_in_parts = (8, 8)                 # forward takes a list; concat -> 16 channels
    Cin = sum(c_in_parts)
    Cmid = bn_size * growthrate         # 32
    Cout = growthrate                   # 8
    drop_rate = 0.0                     # dropout path exists in-kernel; off for determinism

    keys = jax.random.split(key, 12)
    inputs = [
        jax.random.normal(keys[0], (N, c_in_parts[0], H, W), jnp.float32),
        jax.random.normal(keys[1], (N, c_in_parts[1], H, W), jnp.float32),
    ]
    params = dict(
        g1=1.0 + 0.1 * jax.random.normal(keys[2], (Cin,), jnp.float32),
        b1=0.1 * jax.random.normal(keys[3], (Cin,), jnp.float32),
        m1=0.1 * jax.random.normal(keys[4], (Cin,), jnp.float32),
        v1=jax.random.uniform(keys[5], (Cin,), jnp.float32, 0.5, 1.5),
        w1=0.1 * jax.random.normal(keys[6], (Cmid, Cin, 1, 1), jnp.float32),
        g2=1.0 + 0.1 * jax.random.normal(keys[7], (Cmid,), jnp.float32),
        b2=0.1 * jax.random.normal(keys[8], (Cmid,), jnp.float32),
        m2=0.1 * jax.random.normal(keys[9], (Cmid,), jnp.float32),
        v2=jax.random.uniform(keys[10], (Cmid,), jnp.float32, 0.5, 1.5),
        w2=0.1 * jax.random.normal(keys[11], (Cout, Cmid, 3, 3), jnp.float32),
    )

    ref = reference_forward(inputs, params)

    # f32 path: exact semantics of the PyTorch module.
    out = conv_block_forward(inputs, params, drop_rate=drop_rate)
    out = jax.block_until_ready(out)
    assert out.shape == (N, Cout, H, W), out.shape
    assert jnp.allclose(out, ref, atol=1e-4, rtol=1e-4), float(jnp.max(jnp.abs(out - ref)))

    # bf16 matmul-operand variant (perf option for v6e/v7x); looser tolerance.
    out_bf16 = conv_block_forward(inputs, params, drop_rate=drop_rate,
                                  matmul_dtype=jnp.bfloat16)
    out_bf16 = jax.block_until_ready(out_bf16)
    assert jnp.allclose(out_bf16, ref, atol=1e-1, rtol=1e-1), \
        float(jnp.max(jnp.abs(out_bf16 - ref)))

    print("KERNEL_OK")
</pallas_src>

<mosaic_0001>
module attributes {stable_mosaic.version = 11 : i64} {
  func.func @_conv_block_kernel(%arg0: i32, %arg1: memref<1xi32, #tpu.memory_space<smem>>, %arg2: memref<16x256xf32, #tpu.memory_space<vmem>>, %arg3: memref<9x256xf32, #tpu.memory_space<vmem>>, %arg4: memref<16x1xf32, #tpu.memory_space<vmem>>, %arg5: memref<16x1xf32, #tpu.memory_space<vmem>>, %arg6: memref<32x16xf32, #tpu.memory_space<vmem>>, %arg7: memref<32x1xf32, #tpu.memory_space<vmem>>, %arg8: memref<32x1xf32, #tpu.memory_space<vmem>>, %arg9: memref<9x8x32xf32, #tpu.memory_space<vmem>>, %arg10: memref<8x256xf32, #tpu.memory_space<vmem>>) attributes {dimension_semantics = [#tpu.dimension_semantics<parallel>], iteration_bounds = array<i64: 2>, scalar_prefetch = 1 : i64, scratch_operands = 0 : i64, tpu.core_type = #tpu.core_type<tc>, window_params = [{transform_indices = @transform_0, window_bounds = array<i64: 16, 256>}, {pipeline_mode = #tpu.pipeline_mode<synchronous>, transform_indices = @transform_1, window_bounds = array<i64: 9, 256>}, {pipeline_mode = #tpu.pipeline_mode<synchronous>, transform_indices = @transform_2, window_bounds = array<i64: 16, 1>}, {pipeline_mode = #tpu.pipeline_mode<synchronous>, transform_indices = @transform_3, window_bounds = array<i64: 16, 1>}, {pipeline_mode = #tpu.pipeline_mode<synchronous>, transform_indices = @transform_4, window_bounds = array<i64: 32, 16>}, {pipeline_mode = #tpu.pipeline_mode<synchronous>, transform_indices = @transform_5, window_bounds = array<i64: 32, 1>}, {pipeline_mode = #tpu.pipeline_mode<synchronous>, transform_indices = @transform_6, window_bounds = array<i64: 32, 1>}, {pipeline_mode = #tpu.pipeline_mode<synchronous>, transform_indices = @transform_7, window_bounds = array<i64: 9, 8, 32>}, {transform_indices = @transform_8, window_bounds = array<i64: 8, 256>}]} {
    %c0 = arith.constant 0 : index
    %c0_0 = arith.constant 0 : index
    %0 = vector.load %arg2[%c0, %c0_0] : memref<16x256xf32, #tpu.memory_space<vmem>>, vector<16x256xf32>
    %c0_1 = arith.constant 0 : index
    %c0_2 = arith.constant 0 : index
    %1 = vector.load %arg4[%c0_1, %c0_2] : memref<16x1xf32, #tpu.memory_space<vmem>>, vector<16x1xf32>
    %2 = vector.broadcast %1 : vector<16x1xf32> to vector<16x256xf32>
    %3 = arith.mulf %0, %2 : vector<16x256xf32>
    %c0_3 = arith.constant 0 : index
    %c0_4 = arith.constant 0 : index
    %4 = vector.load %arg5[%c0_3, %c0_4] : memref<16x1xf32, #tpu.memory_space<vmem>>, vector<16x1xf32>
    %5 = vector.broadcast %4 : vector<16x1xf32> to vector<16x256xf32>
    %6 = arith.addf %3, %5 : vector<16x256xf32>
    %cst = arith.constant 0.000000e+00 : f32
    %7 = vector.broadcast %cst : f32 to vector<16x256xf32>
    %8 = arith.maximumf %6, %7 : vector<16x256xf32>
    %c0_5 = arith.constant 0 : index
    %c0_6 = arith.constant 0 : index
    %9 = vector.load %arg6[%c0_5, %c0_6] : memref<32x16xf32, #tpu.memory_space<vmem>>, vector<32x16xf32>
    %cst_7 = arith.constant dense<0.000000e+00> : vector<32x256xf32>
    %10 = tpu.matmul %9, %8, %cst_7 {dimension_numbers = #tpu.dot_dimension_numbers<[1], [0], [0], [1], [0, 0, 1, 1], [], []>} : vector<32x16xf32>, vector<16x256xf32>, vector<32x256xf32> -> vector<32x256xf32>
    %c0_8 = arith.constant 0 : index
    %c0_9 = arith.constant 0 : index
    %11 = vector.load %arg7[%c0_8, %c0_9] : memref<32x1xf32, #tpu.memory_space<vmem>>, vector<32x1xf32>
    %12 = vector.broadcast %11 : vector<32x1xf32> to vector<32x256xf32>
    %13 = arith.mulf %10, %12 : vector<32x256xf32>
    %c0_10 = arith.constant 0 : index
    %c0_11 = arith.constant 0 : index
    %14 = vector.load %arg8[%c0_10, %c0_11] : memref<32x1xf32, #tpu.memory_space<vmem>>, vector<32x1xf32>
    %15 = vector.broadcast %14 : vector<32x1xf32> to vector<32x256xf32>
    %16 = arith.addf %13, %15 : vector<32x256xf32>
    %cst_12 = arith.constant 0.000000e+00 : f32
    %17 = vector.broadcast %cst_12 : f32 to vector<32x256xf32>
    %18 = arith.maximumf %16, %17 : vector<32x256xf32>
    %c4 = arith.constant 4 : index
    %c0_13 = arith.constant 0 : index
    %c0_14 = arith.constant 0 : index
    %19 = vector.load %arg9[%c4, %c0_13, %c0_14] : memref<9x8x32xf32, #tpu.memory_space<vmem>>, vector<1x8x32xf32>
    %20 = vector.shape_cast %19 : vector<1x8x32xf32> to vector<8x32xf32>
    %cst_15 = arith.constant dense<0.000000e+00> : vector<8x256xf32>
    %21 = tpu.matmul %20, %18, %cst_15 {dimension_numbers = #tpu.dot_dimension_numbers<[1], [0], [0], [1], [0, 0, 1, 1], [], []>} : vector<8x32xf32>, vector<32x256xf32>, vector<8x256xf32> -> vector<8x256xf32>
    %c17_i32 = arith.constant 17 : i32
    %22 = tpu.dynamic_rotate %18 by %c17_i32 dim 1 : vector<32x256xf32>, i32 -> vector<32x256xf32>
    %c0_16 = arith.constant 0 : index
    %c0_17 = arith.constant 0 : index
    %c0_18 = arith.constant 0 : index
    %23 = vector.load %arg9[%c0_16, %c0_17, %c0_18] : memref<9x8x32xf32, #tpu.memory_space<vmem>>, vector<1x8x32xf32>
    %24 = vector.shape_cast %23 : vector<1x8x32xf32> to vector<8x32xf32>
    %cst_19 = arith.constant dense<0.000000e+00> : vector<8x256xf32>
    %25 = tpu.matmul %24, %22, %cst_19 {dimension_numbers = #tpu.dot_dimension_numbers<[1], [0], [0], [1], [0, 0, 1, 1], [], []>} : vector<8x32xf32>, vector<32x256xf32>, vector<8x256xf32> -> vector<8x256xf32>
    %c0_20 = arith.constant 0 : index
    %c0_21 = arith.constant 0 : index
    %26 = vector.load %arg3[%c0_20, %c0_21] : memref<9x256xf32, #tpu.memory_space<vmem>>, vector<1x256xf32>
    %27 = vector.broadcast %26 : vector<1x256xf32> to vector<8x256xf32>
    %28 = arith.mulf %25, %27 : vector<8x256xf32>
    %29 = arith.addf %21, %28 : vector<8x256xf32>
    %c16_i32 = arith.constant 16 : i32
    %30 = tpu.dynamic_rotate %18 by %c16_i32 dim 1 : vector<32x256xf32>, i32 -> vector<32x256xf32>
    %c1 = arith.constant 1 : index
    %c0_22 = arith.constant 0 : index
    %c0_23 = arith.constant 0 : index
    %31 = vector.load %arg9[%c1, %c0_22, %c0_23] : memref<9x8x32xf32, #tpu.memory_space<vmem>>, vector<1x8x32xf32>
    %32 = vector.shape_cast %31 : vector<1x8x32xf32> to vector<8x32xf32>
    %cst_24 = arith.constant dense<0.000000e+00> : vector<8x256xf32>
    %33 = tpu.matmul %32, %30, %cst_24 {dimension_numbers = #tpu.dot_dimension_numbers<[1], [0], [0], [1], [0, 0, 1, 1], [], []>} : vector<8x32xf32>, vector<32x256xf32>, vector<8x256xf32> -> vector<8x256xf32>
    %c1_25 = arith.constant 1 : index
    %c0_26 = arith.constant 0 : index
    %34 = vector.load %arg3[%c1_25, %c0_26] : memref<9x256xf32, #tpu.memory_space<vmem>>, vector<1x256xf32>
    %35 = vector.broadcast %34 : vector<1x256xf32> to vector<8x256xf32>
    %36 = arith.mulf %33, %35 : vector<8x256xf32>
    %37 = arith.addf %29, %36 : vector<8x256xf32>
    %c15_i32 = arith.constant 15 : i32
    %38 = tpu.dynamic_rotate %18 by %c15_i32 dim 1 : vector<32x256xf32>, i32 -> vector<32x256xf32>
    %c2 = arith.constant 2 : index
    %c0_27 = arith.constant 0 : index
    %c0_28 = arith.constant 0 : index
    %39 = vector.load %arg9[%c2, %c0_27, %c0_28] : memref<9x8x32xf32, #tpu.memory_space<vmem>>, vector<1x8x32xf32>
    %40 = vector.shape_cast %39 : vector<1x8x32xf32> to vector<8x32xf32>
    %cst_29 = arith.constant dense<0.000000e+00> : vector<8x256xf32>
    %41 = tpu.matmul %40, %38, %cst_29 {dimension_numbers = #tpu.dot_dimension_numbers<[1], [0], [0], [1], [0, 0, 1, 1], [], []>} : vector<8x32xf32>, vector<32x256xf32>, vector<8x256xf32> -> vector<8x256xf32>
    %c2_30 = arith.constant 2 : index
    %c0_31 = arith.constant 0 : index
    %42 = vector.load %arg3[%c2_30, %c0_31] : memref<9x256xf32, #tpu.memory_space<vmem>>, vector<1x256xf32>
    %43 = vector.broadcast %42 : vector<1x256xf32> to vector<8x256xf32>
    %44 = arith.mulf %41, %43 : vector<8x256xf32>
    %45 = arith.addf %37, %44 : vector<8x256xf32>
    %c1_i32 = arith.constant 1 : i32
    %46 = tpu.dynamic_rotate %18 by %c1_i32 dim 1 : vector<32x256xf32>, i32 -> vector<32x256xf32>
    %c3 = arith.constant 3 : index
    %c0_32 = arith.constant 0 : index
    %c0_33 = arith.constant 0 : index
    %47 = vector.load %arg9[%c3, %c0_32, %c0_33] : memref<9x8x32xf32, #tpu.memory_space<vmem>>, vector<1x8x32xf32>
    %48 = vector.shape_cast %47 : vector<1x8x32xf32> to vector<8x32xf32>
    %cst_34 = arith.constant dense<0.000000e+00> : vector<8x256xf32>
    %49 = tpu.matmul %48, %46, %cst_34 {dimension_numbers = #tpu.dot_dimension_numbers<[1], [0], [0], [1], [0, 0, 1, 1], [], []>} : vector<8x32xf32>, vector<32x256xf32>, vector<8x256xf32> -> vector<8x256xf32>
    %c3_35 = arith.constant 3 : index
    %c0_36 = arith.constant 0 : index
    %50 = vector.load %arg3[%c3_35, %c0_36] : memref<9x256xf32, #tpu.memory_space<vmem>>, vector<1x256xf32>
    %51 = vector.broadcast %50 : vector<1x256xf32> to vector<8x256xf32>
    %52 = arith.mulf %49, %51 : vector<8x256xf32>
    %53 = arith.addf %45, %52 : vector<8x256xf32>
    %c255_i32 = arith.constant 255 : i32
    %54 = tpu.dynamic_rotate %18 by %c255_i32 dim 1 : vector<32x256xf32>, i32 -> vector<32x256xf32>
    %c5 = arith.constant 5 : index
    %c0_37 = arith.constant 0 : index
    %c0_38 = arith.constant 0 : index
    %55 = vector.load %arg9[%c5, %c0_37, %c0_38] : memref<9x8x32xf32, #tpu.memory_space<vmem>>, vector<1x8x32xf32>
    %56 = vector.shape_cast %55 : vector<1x8x32xf32> to vector<8x32xf32>
    %cst_39 = arith.constant dense<0.000000e+00> : vector<8x256xf32>
    %57 = tpu.matmul %56, %54, %cst_39 {dimension_numbers = #tpu.dot_dimension_numbers<[1], [0], [0], [1], [0, 0, 1, 1], [], []>} : vector<8x32xf32>, vector<32x256xf32>, vector<8x256xf32> -> vector<8x256xf32>
    %c5_40 = arith.constant 5 : index
    %c0_41 = arith.constant 0 : index
    %58 = vector.load %arg3[%c5_40, %c0_41] : memref<9x256xf32, #tpu.memory_space<vmem>>, vector<1x256xf32>
    %59 = vector.broadcast %58 : vector<1x256xf32> to vector<8x256xf32>
    %60 = arith.mulf %57, %59 : vector<8x256xf32>
    %61 = arith.addf %53, %60 : vector<8x256xf32>
    %c241_i32 = arith.constant 241 : i32
    %62 = tpu.dynamic_rotate %18 by %c241_i32 dim 1 : vector<32x256xf32>, i32 -> vector<32x256xf32>
    %c6 = arith.constant 6 : index
    %c0_42 = arith.constant 0 : index
    %c0_43 = arith.constant 0 : index
    %63 = vector.load %arg9[%c6, %c0_42, %c0_43] : memref<9x8x32xf32, #tpu.memory_space<vmem>>, vector<1x8x32xf32>
    %64 = vector.shape_cast %63 : vector<1x8x32xf32> to vector<8x32xf32>
    %cst_44 = arith.constant dense<0.000000e+00> : vector<8x256xf32>
    %65 = tpu.matmul %64, %62, %cst_44 {dimension_numbers = #tpu.dot_dimension_numbers<[1], [0], [0], [1], [0, 0, 1, 1], [], []>} : vector<8x32xf32>, vector<32x256xf32>, vector<8x256xf32> -> vector<8x256xf32>
    %c6_45 = arith.constant 6 : index
    %c0_46 = arith.constant 0 : index
    %66 = vector.load %arg3[%c6_45, %c0_46] : memref<9x256xf32, #tpu.memory_space<vmem>>, vector<1x256xf32>
    %67 = vector.broadcast %66 : vector<1x256xf32> to vector<8x256xf32>
    %68 = arith.mulf %65, %67 : vector<8x256xf32>
    %69 = arith.addf %61, %68 : vector<8x256xf32>
    %c240_i32 = arith.constant 240 : i32
    %70 = tpu.dynamic_rotate %18 by %c240_i32 dim 1 : vector<32x256xf32>, i32 -> vector<32x256xf32>
    %c7 = arith.constant 7 : index
    %c0_47 = arith.constant 0 : index
    %c0_48 = arith.constant 0 : index
    %71 = vector.load %arg9[%c7, %c0_47, %c0_48] : memref<9x8x32xf32, #tpu.memory_space<vmem>>, vector<1x8x32xf32>
    %72 = vector.shape_cast %71 : vector<1x8x32xf32> to vector<8x32xf32>
    %cst_49 = arith.constant dense<0.000000e+00> : vector<8x256xf32>
    %73 = tpu.matmul %72, %70, %cst_49 {dimension_numbers = #tpu.dot_dimension_numbers<[1], [0], [0], [1], [0, 0, 1, 1], [], []>} : vector<8x32xf32>, vector<32x256xf32>, vector<8x256xf32> -> vector<8x256xf32>
    %c7_50 = arith.constant 7 : index
    %c0_51 = arith.constant 0 : index
    %74 = vector.load %arg3[%c7_50, %c0_51] : memref<9x256xf32, #tpu.memory_space<vmem>>, vector<1x256xf32>
    %75 = vector.broadcast %74 : vector<1x256xf32> to vector<8x256xf32>
    %76 = arith.mulf %73, %75 : vector<8x256xf32>
    %77 = arith.addf %69, %76 : vector<8x256xf32>
    %c239_i32 = arith.constant 239 : i32
    %78 = tpu.dynamic_rotate %18 by %c239_i32 dim 1 : vector<32x256xf32>, i32 -> vector<32x256xf32>
    %c8 = arith.constant 8 : index
    %c0_52 = arith.constant 0 : index
    %c0_53 = arith.constant 0 : index
    %79 = vector.load %arg9[%c8, %c0_52, %c0_53] : memref<9x8x32xf32, #tpu.memory_space<vmem>>, vector<1x8x32xf32>
    %80 = vector.shape_cast %79 : vector<1x8x32xf32> to vector<8x32xf32>
    %cst_54 = arith.constant dense<0.000000e+00> : vector<8x256xf32>
    %81 = tpu.matmul %80, %78, %cst_54 {dimension_numbers = #tpu.dot_dimension_numbers<[1], [0], [0], [1], [0, 0, 1, 1], [], []>} : vector<8x32xf32>, vector<32x256xf32>, vector<8x256xf32> -> vector<8x256xf32>
    %c8_55 = arith.constant 8 : index
    %c0_56 = arith.constant 0 : index
    %82 = vector.load %arg3[%c8_55, %c0_56] : memref<9x256xf32, #tpu.memory_space<vmem>>, vector<1x256xf32>
    %83 = vector.broadcast %82 : vector<1x256xf32> to vector<8x256xf32>
    %84 = arith.mulf %81, %83 : vector<8x256xf32>
    %85 = arith.addf %77, %84 : vector<8x256xf32>
    %c0_57 = arith.constant 0 : index
    %c0_58 = arith.constant 0 : index
    %86 = vector.load %arg10[%c0_57, %c0_58] : memref<8x256xf32, #tpu.memory_space<vmem>>, vector<8x256xf32>
    tpu.vector_store %arg10[%c0_57, %c0_58], %85 {strides = array<i32>} : memref<8x256xf32, #tpu.memory_space<vmem>>, vector<8x256xf32>,
    return
  }
  func.func @transform_0(%arg0: i32, %arg1: memref<1xi32, #tpu.memory_space<smem>>) -> (i32, i32) {
    %c0_i32 = arith.constant 0 : i32
    %c0_i32_0 = arith.constant 0 : i32
    return %c0_i32, %arg0 : i32, i32
  }
  func.func @transform_1(%arg0: i32, %arg1: memref<1xi32, #tpu.memory_space<smem>>) -> (i32, i32) {
    %c0_i32 = arith.constant 0 : i32
    %c0_i32_0 = arith.constant 0 : i32
    %c0_i32_1 = arith.constant 0 : i32
    return %c0_i32, %c0_i32_0 : i32, i32
  }
  func.func @transform_2(%arg0: i32, %arg1: memref<1xi32, #tpu.memory_space<smem>>) -> (i32, i32) {
    %c0_i32 = arith.constant 0 : i32
    %c0_i32_0 = arith.constant 0 : i32
    %c0_i32_1 = arith.constant 0 : i32
    return %c0_i32, %c0_i32_0 : i32, i32
  }
  func.func @transform_3(%arg0: i32, %arg1: memref<1xi32, #tpu.memory_space<smem>>) -> (i32, i32) {
    %c0_i32 = arith.constant 0 : i32
    %c0_i32_0 = arith.constant 0 : i32
    %c0_i32_1 = arith.constant 0 : i32
    return %c0_i32, %c0_i32_0 : i32, i32
  }
  func.func @transform_4(%arg0: i32, %arg1: memref<1xi32, #tpu.memory_space<smem>>) -> (i32, i32) {
    %c0_i32 = arith.constant 0 : i32
    %c0_i32_0 = arith.constant 0 : i32
    %c0_i32_1 = arith.constant 0 : i32
    return %c0_i32, %c0_i32_0 : i32, i32
  }
  func.func @transform_5(%arg0: i32, %arg1: memref<1xi32, #tpu.memory_space<smem>>) -> (i32, i32) {
    %c0_i32 = arith.constant 0 : i32
    %c0_i32_0 = arith.constant 0 : i32
    %c0_i32_1 = arith.constant 0 : i32
    return %c0_i32, %c0_i32_0 : i32, i32
  }
  func.func @transform_6(%arg0: i32, %arg1: memref<1xi32, #tpu.memory_space<smem>>) -> (i32, i32) {
    %c0_i32 = arith.constant 0 : i32
    %c0_i32_0 = arith.constant 0 : i32
    %c0_i32_1 = arith.constant 0 : i32
    return %c0_i32, %c0_i32_0 : i32, i32
  }
  func.func @transform_7(%arg0: i32, %arg1: memref<1xi32, #tpu.memory_space<smem>>) -> (i32, i32, i32) {
    %c0_i32 = arith.constant 0 : i32
    %c0_i32_0 = arith.constant 0 : i32
    %c0_i32_1 = arith.constant 0 : i32
    %c0_i32_2 = arith.constant 0 : i32
    return %c0_i32, %c0_i32_0, %c0_i32_1 : i32, i32, i32
  }
  func.func @transform_8(%arg0: i32, %arg1: memref<1xi32, #tpu.memory_space<smem>>) -> (i32, i32) {
    %c0_i32 = arith.constant 0 : i32
    %c0_i32_0 = arith.constant 0 : i32
    return %c0_i32, %arg0 : i32, i32
  }
}

</mosaic_0001>

<bundles_post_ra>
// kernel: tpu_custom_call.1
= control target key start
LH: loop header
LB: loop body
LE: loop exit
PB: predicated region body
PF: predicated region fallthrough
CT: control target
= control target key end

     0   :  { %15 = vsyncpa [#allocation6], 0  ;;  %s2611_s0 = inlined_call_operand.<no memory space> [shape: s32[1], index: 0, kind: input, shape index: {}]   ;;  %s2612_s1 = inlined_call_operand.vmem [shape: f32[16,512], index: 1, kind: input, shape index: {}]   ;;  %s2613_s2 = inlined_call_operand.hbm [shape: f32[9,256], index: 2, kind: input, shape index: {}]   ;;  %s2614_s3 = inlined_call_operand.vmem [shape: f32[16,1], index: 3, kind: input, shape index: {}]   ;;  %s2615_s4 = inlined_call_operand.vmem [shape: f32[16,1], index: 4, kind: input, shape index: {}]   ;;  %s2616_s5 = inlined_call_operand.vmem [shape: f32[32,16], index: 5, kind: input, shape index: {}]   ;;  %s2617_s6 = inlined_call_operand.vmem [shape: f32[32,1], index: 6, kind: input, shape index: {}]   ;;  %s2618_s7 = inlined_call_operand.vmem [shape: f32[32,1], index: 7, kind: input, shape index: {}]   ;;  %s2619_s8 = inlined_call_operand.vmem [shape: f32[9,8,32], index: 8, kind: input, shape index: {}]   ;;  %s2620_s9 = inlined_call_operand.hbm [shape: f32[8,512], index: 9, kind: output, shape index: {}]  }
   0x1   :  { %16 = vsyncpa [#allocation7], 0 }
   0x2   :  { %18 = vsyncpa [#allocation7 + $0x1], 0  ;;  %s1939_s29 = smov 0   ;;  %s1941_s30 = smov 0  }
   0x3   :  { %s1943_s10 = smov 0   ;;  %s1945_s11 = smov 0  }
   0x4 LB: > { %s1960_s12 = sadd.s32 4294967295, %s1873_s11   ;;  %s1680_s13 = sadd.s32 4294967294, %s1873_s11   ;;  %s1873_s11 = sphi %s1945_s11, %s2631_s11   ;;  %s1869_s10 = sphi %s1943_s10, %s2630_s10   ;;  %s1865_s30 = sphi %s1941_s30, %s2629_s30   ;;  %s1861_s29 = sphi %s1939_s29, %s2628_s29  }
   0x5   : > { %s1964_s14 = sadd.s32 1, %s1873_s11   ;;  %s31_s15 = sadd.s32 1, %s1869_s10 }
   0x6   : > { %s28_s16 = ssub.s32 %s1873_s11, %s1964_s14  ;;  %p38_p0 = scmp.ne.s32.totalorder %s1869_s10, %s1865_s30 }
   0x7   : > { %p29_p1 = scmp.eq.s32.totalorder %s28_s16, 0  ;;  %p39_p2 = scmp.eq.s32.totalorder %s1873_s11, 0 }
   0x8   : > { %p215_p3 = scmp.eq.s32.totalorder %s1960_s12, 1  ;;  %p220_p4 = scmp.ne.s32.totalorder %s1865_s30, %s1861_s29 }
   0x9   : > { %s1976_s17 = scalar_select %p29_p1, %s1869_s10, %s31_s15  }
   0xa   : > { %p1978_p5 = por %p39_p2, %p38_p0  ;;  %p1982_p6 = por %p215_p3, %p38_p0 }
   0xb   : > { %p221_p7 = scmp.eq.s32.totalorder %s1680_s13, 1  ;;  %p1681_p8 = scmp.ge.s32.totalorder %s1873_s11, 1 }
   0xc   : > { %s2623_s19 = scalar_select %p1982_p6, 1, 0 }
   0xd   : > { %p228_p9 = scmp.lt.s32.totalorder %s1873_s11, 3  ;;  %p1988_p10 = por %p221_p7, %p220_p4 }
   0xe   : > { %p1733_p11 = scmp.eq.s32.totalorder %s1960_s12, 0  ;;  %s1875_s22 = smov [#allocation5]  }
   0xf   : > { %s2624_s20 = scalar_select %p1988_p10, 1, 0 }
  0x10   : > { %p1993_p12 = pnand %p1681_p8, %p228_p9  ;;  %s240_s23 = sshll.u32 %s1875_s22, 4  ;;  %s241_s23 = int_to_ptr.vmem [resolvable:$true] %s240_s23 }
  0x11   : > { %s1794_s24 = scalar_lea.vmem %s241_s23, 512  ;;  %p1802_p7 = scmp.lt.s32.totalorder %s241_s23, %s241_s23 }
  0x12   : > { %p1725_p13 = pneg %p1993_p12  ;;  %p1795_p2 = scmp.ne.s32.totalorder %s241_s23, %s1794_s24 }
  0x13   : > { %p1803_p10 = scmp.lt.s32.totalorder %s1794_s24, %s1794_s24 }
  0x14   : > { %p1726_p0 = pnand %p1733_p11, %p1725_p13 }
  0x15   : > { %p1804_p6 = por %p1803_p10, %p1802_p7 }
  0x16   : > { %p1785_p1 = pneg %p1726_p0 }
  0x18   : > { %p1797_p3 = pnand %p1795_p2, %p1785_p1 }
  0x1a   : > { %p1798_p4 = pneg %p1797_p3 }
  0x1c   : > { %p1805_p8 = pnand %p1804_p6, %p1798_p4 }
  0x1e   : > { %1808 = shalt.err (!%p1805_p8)
}
  0x1f   : > { %s1876_s0 = smov 256   ;;  %s1877_s25 = smov 16  }
  0x20   : > { %1728 = dma.hbm_to_vmem [thread:$0]  (!%p1726_p0), %s2613_s2, 512, %s241_s23, [#allocation6], %s1876_s0, %s1876_s0, %s1877_s25  }
  0x21   : > { %p1683_p9 = scmp.ge.s32.totalorder %s1873_s11, 2 }
  0x23   : > { %268 = sbr.rel (%p1683_p9) target bundleno = 46 (0x2e), region = 44 }
  0x28   : > { %271 = sbr.rel (!%p1978_p5) target bundleno = 46 (0x2e), region = 48  ;;  %s273_s28 = sand.u32 (%p1978_p5), 1, %s1869_s10  }
  0x29   : > { %s1717_s13 = sshll.u32 (%p1978_p5), %s1873_s11, 4  ;;  %s1684_s15 = sshll.u32 (%p1978_p5), %s273_s28, 5 }
  0x2a   : > { %s278_s24 = scalar_lea.vmem (%p1978_p5), %s2612_s1, %s1717_s13  ;;  %s275_s23 = scalar_lea.vmem (%p1978_p5), [#allocation4], %s1684_s15 }
  0x2b   : > { %v291_v0 = vld [vmem:[%s278_s24] sm:$0xff] (%p1978_p5)  ;;  %v293_v1 = vld [vmem:[%s278_s24 + $0x8] sm:$0xff] (%p1978_p5) }
  0x2c   : > { %v295_v2 = vld [vmem:[%s278_s24 + $0x20] sm:$0xff] (%p1978_p5)  ;;  %292 = vst [vmem:[%s275_s23] sm:$0xff] (%p1978_p5), %v291_v0  ;;  %294 = vst [vmem:[%s275_s23 + $0x8] sm:$0xff] (%p1978_p5), %v293_v1  ;;  %v297_v3 = vld [vmem:[%s278_s24 + $0x28] sm:$0xff] (%p1978_p5) }
  0x2d   : > { %296 = vst [vmem:[%s275_s23 + $0x10] sm:$0xff] %v295_v2  ;;  %298 = vst [vmem:[%s275_s23 + $0x18] sm:$0xff] %v297_v3 }
  0x2e PF: > { %307 = sbr.rel (%p1993_p12) target bundleno = 851 (0x353), region = 71  ;;  %s2017_s18 = sand.u32 (!%p1993_p12), 1, %s1865_s30  }
  0x2f   : > { %s1688_s0 = sshll.u32 (!%p1993_p12), %s2017_s18, 5 }
  0x30   : > { %s2020_s25 = scalar_lea.vmem (!%p1993_p12), [#allocation4], %s1688_s0 }
  0x33   : > { %1852 = dma.done.wait (%p1733_p11), [#allocation6], 512  }
  0x34   : > { %1854 = vsyncadd (%p1733_p11), [#allocation6], 4294966784  ;;  %v1878_v4 = vmov 0   ;;  %v370_v5 = vld [vmem:[%s2615_s4 + $0x8] sm:$0xff]  ;;  %v369_v7 = vld [vmem:[%s2615_s4] sm:$0xff]  ;;  %v1879_v11 = vmov 0.0  }
  0x35   : > { %1782 = vset.pattern.permute.xlu1 %v1878_v4  ;;  %1781 = vset.pattern.permute.xlu0 %v1878_v4  ;;  %v354_v6 = vld [vmem:[%s2614_s3 + $0x8] sm:$0xff]  ;;  %v353_v8 = vld [vmem:[%s2614_s3] sm:$0xff]  ;;  %v497_v9 = vld [vmem:[%s2617_s6 + $0x10] sm:$0xff]  ;;  %vm393_vm0 = vcmask 130048   ;;  %s1880_s23 = smov 17   ;;  %s1881_s0 = smov 16  }
  0x36   : > { %378 = vperm.xlu1 %1782, %v370_v5   ;;  %362 = vperm.xlu0 %1781, %v354_v6   ;;  %v498_v10 = vld [vmem:[%s2617_s6 + $0x18] sm:$0xff]  ;;  %v496_v12 = vld [vmem:[%s2617_s6 + $0x8] sm:$0xff]  ;;  %v495_v14 = vld [vmem:[%s2617_s6] sm:$0xff]  ;;  %s1882_s26 = smov 15   ;;  %s1883_s27 = smov 1   ;;  %vm597_vm8 = vcmask 261120  }
  0x37   : > { %470 = vmatprep.mubr.f32.mxu0 %v1879_v11  ;;  %665 = vmatprep.mubr.f32.mxu1 %v1879_v11  ;;  %v530_v13 = vld [vmem:[%s2618_s7 + $0x18] sm:$0xff]  ;;  %v529_v15 = vld [vmem:[%s2618_s7 + $0x10] sm:$0xff]  ;;  %v527_v16 = vld [vmem:[%s2618_s7] sm:$0xff]  ;;  %s1884_s21 = smov 127   ;;  %s1885_s28 = smov 113  }
  0x38   : > { %v528_v17 = vld [vmem:[%s2618_s7 + $0x8] sm:$0xff]  ;;  %v351_v18 = vld [vmem:[%s2020_s25 + $0x10] sm:$0xff]  ;;  %v352_v19 = vld [vmem:[%s2020_s25 + $0x18] sm:$0xff]  ;;  %s1887_s13 = smov 111   ;;  %s1589_s16 = scalar_lea.sflag [#allocation7], %s2017_s18 }
  0x39   : > { %v349_v24 = vld [vmem:[%s2020_s25] sm:$0xff]  ;;  %v350_v25 = vld [vmem:[%s2020_s25 + $0x8] sm:$0xff]  ;;  %v391_v40 = vld [vmem:[%s2616_s5 + $0x10] sm:$0xff]  ;;  %s1886_s25 = smov 112   ;;  %p2626_p6 = scmp.ne.s32.totalorder %s2623_s19, 0 }
  0x3a   : > { %373 = vperm.xlu1 %1782, %v369_v7   ;;  %357 = vperm.xlu0 %1781, %v353_v8   ;;  %v389_v38 = vld [vmem:[%s2616_s5] sm:$0xff]  ;;  %v390_v39 = vld [vmem:[%s2616_s5 + $0x8] sm:$0xff]  ;;  %v392_v41 = vld [vmem:[%s2616_s5 + $0x18] sm:$0xff] }
  0x3e   : > { %511 = vperm.xlu1 %1782, %v497_v9   ;;  %516 = vperm.xlu0 %1781, %v498_v10  }
  0x42   : > { %506 = vperm.xlu1 %1782, %v496_v12   ;;  %548 = vperm.xlu0 %1781, %v530_v13  }
  0x46   : > { %501 = vperm.xlu1 %1782, %v495_v14   ;;  %543 = vperm.xlu0 %1781, %v529_v15  }
  0x4a   : > { %533 = vperm.xlu1 %1782, %v527_v16   ;;  %538 = vperm.xlu0 %1781, %v528_v17  }
  0xb1   : > { %v379_v20 = vpop.permute.xlu1 %378  ;;  %v363_v21 = vpop.permute.xlu0 %362 }
  0xb2   : > { %v367_v22 = vmul.f32 %v363_v21, %v351_v18  ;;  %v368_v23 = vmul.f32 %v363_v21, %v352_v19  ;;  %v585_v19 = vlaneseq }
  0xb4   : > { %v384_v26 = vadd.f32 %v379_v20, %v368_v23  ;;  %v383_v27 = vadd.f32 %v379_v20, %v367_v22  ;;  %v2221_v20 = vand.u32 127, %v585_v19 }
  0xb5   : > { %v358_v28 = vpop.permute.xlu0 %357  ;;  %v374_v33 = vpop.permute.xlu1 %373 }
  0xb6   : > { %v365_v29 = vmul.f32 %v358_v28, %v349_v24  ;;  %v366_v30 = vmul.f32 %v358_v28, %v350_v25  ;;  %v388_v31 = vmax.f32 %v384_v26, 0.0  ;;  %v387_v32 = vmax.f32 %v383_v27, 0.0 }
  0xb7   : > { %vm587_vm1 = vcmp.lt.s32.totalorder %v2221_v20, 17  ;;  %vm776_vm2 = vcmp.lt.s32.totalorder %v2221_v20, 16  ;;  %vm894_vm3 = vcmp.lt.s32.totalorder %v2221_v20, 15  ;;  %vm1012_vm4 = vcmp.lt.s32.totalorder %v2221_v20, 1 }
  0xb8   : > { %v381_v34 = vadd.f32 %v374_v33, %v365_v29  ;;  %v382_v35 = vadd.f32 %v374_v33, %v366_v30  ;;  %434 = vmatprep.subr.mxu0 %v388_v31  ;;  %vm1130_vm5 = vcmp.lt.s32.totalorder %v2221_v20, 127  ;;  %vm1248_vm6 = vcmp.lt.s32.totalorder %v2221_v20, 113 }
  0xb9   : > { %435 = vmatpush1.msra.mxu0 %v387_v32  ;;  %v512_v42 = vpop.permute.xlu1 %511  ;;  %v2086_v53 = vpop.permute.xlu0 %516  ;;  %vm1366_vm7 = vcmp.lt.s32.totalorder %v2221_v20, 112  ;;  %vm1484_vm9 = vcmp.lt.s32.totalorder %v2221_v20, 111  ;;  %v675_v20 = vshrl.u32 %v585_v19, 7 }
  0xba   : > { %v386_v36 = vmax.f32 %v382_v35, 0.0  ;;  %v385_v37 = vmax.f32 %v381_v34, 0.0 }
  0xbc   : > { %436 = vmatprep.subr.mxu0 %v386_v36 }
  0xbd   : > { %437 = vmatpush1.msra.mxu0 %v385_v37  ;;  %v507_v43 = vpop.permute.xlu1 %506  ;;  %v2096_v55 = vpop.permute.xlu0 %548 }
  0xbe   : > { %1691 = vmatmul.mubr.msk.f32.vlgmr.msra.gmra.mxu0 %vm393_vm0, %v389_v38 }
  0xbf   : > { %476 = vmatprep.mubr.f32.mxu0 %v1879_v11 }
  0xc1   : > { %v502_v44 = vpop.permute.xlu1 %501  ;;  %v544_v57 = vpop.permute.xlu0 %543 }
  0xc2   : > { %1692 = vmatmul.mubr.msk.f32.gmra.mxu0 %vm393_vm0, %v390_v39 }
  0xc3   : > { %482 = vmatprep.mubr.f32.mxu0 %v1879_v11 }
  0xc5   : > { %v534_v47 = vpop.permute.xlu1 %533  ;;  %v539_v61 = vpop.permute.xlu0 %538 }
  0xc6   : > { %1693 = vmatmul.mubr.msk.f32.gmra.mxu0 %vm393_vm0, %v391_v40 }
  0xc7   : > { %488 = vmatprep.mubr.f32.mxu0 %v1879_v11 }
  0xca   : > { %1694 = vmatmul.mubr.msk.f32.gmra.mxu0 %vm393_vm0, %v392_v41 }
  0xcb   : > { %854 = vmatprep.mubr.f32.mxu0 %v1879_v11 }
 0x17e   : > { %v472_v45 = vpop.f32.mrf.mxu0 }
 0x17f   : > { %v519_v46 = vmul.f32 %v502_v44, %v472_v45 }
 0x180   : > { %v474_v48 = vpop.f32.mrf.mxu0 }
 0x181   : > { %v551_v49 = vadd.f32 %v534_v47, %v519_v46  ;;  %v520_v50 = vmul.f32 %v502_v44, %v474_v48 }
 0x182   : > { %v478_v56 = vpop.f32.mrf.mxu0 }
 0x183   : > { %v2084_v51 = vmax.f32 %v551_v49, 0.0  ;;  %v552_v52 = vadd.f32 %v534_v47, %v520_v50  ;;  %v521_v59 = vmul.f32 %v507_v43, %v478_v56 }
 0x184   : > { %v480_v58 = vpop.f32.mrf.mxu0 }
 0x185   : > { %v2088_v54 = vmax.f32 %v552_v52, 0.0  ;;  %569 = vrot.lane.b32.xlu0 %v2084_v51, %s1880_s23  ;;  %v522_v60 = vmul.f32 %v507_v43, %v480_v58  ;;  %v553_v62 = vadd.f32 %v539_v61, %v521_v59 }
 0x186   : > { %v484_v2 = vpop.f32.mrf.mxu0 }
 0x187   : > { %577 = vrot.lane.b32.xlu1 %v2088_v54, %s1880_s23  ;;  %v554_v63 = vadd.f32 %v539_v61, %v522_v60  ;;  %v2114_v0 = vmax.f32 %v553_v62, 0.0  ;;  %v523_v4 = vmul.f32 %v512_v42, %v484_v2 }
 0x188   : > { %v486_v3 = vpop.f32.mrf.mxu0 }
 0x189   : > { %760 = vrot.lane.b32.xlu0 %v2084_v51, %s1881_s0  ;;  %v2118_v1 = vmax.f32 %v554_v63, 0.0  ;;  %v524_v5 = vmul.f32 %v512_v42, %v486_v3  ;;  %v555_v6 = vadd.f32 %v544_v57, %v523_v4 }
 0x18a   : > { %v490_v10 = vpop.f32.mrf.mxu0 }
 0x18b   : > { %768 = vrot.lane.b32.xlu1 %v2088_v54, %s1881_s0  ;;  %v556_v7 = vadd.f32 %v544_v57, %v524_v5  ;;  %v2146_v8 = vmax.f32 %v555_v6, 0.0  ;;  %v525_v13 = vmul.f32 %v2086_v53, %v490_v10 }
 0x18c   : > { %v492_v12 = vpop.f32.mrf.mxu0 }
 0x18d   : > { %878 = vrot.lane.b32.xlu0 %v2084_v51, %s1882_s26  ;;  %v2150_v9 = vmax.f32 %v556_v7, 0.0  ;;  %v526_v14 = vmul.f32 %v2086_v53, %v492_v12  ;;  %v557_v15 = vadd.f32 %v2096_v55, %v525_v13 }
 0x18f   : > { %886 = vrot.lane.b32.xlu1 %v2088_v54, %s1882_s26  ;;  %v558_v16 = vadd.f32 %v2096_v55, %v526_v14  ;;  %v2186_v17 = vmax.f32 %v557_v15, 0.0 }
 0x191   : > { %996 = vrot.lane.b32.xlu0 %v2084_v51, %s1883_s27  ;;  %v2190_v18 = vmax.f32 %v558_v16, 0.0 }
 0x193   : > { %1004 = vrot.lane.b32.xlu1 %v2088_v54, %s1883_s27 }
 0x195   : > { %1114 = vrot.lane.b32.xlu0 %v2084_v51, %s1884_s21 }
 0x197   : > { %1122 = vrot.lane.b32.xlu1 %v2088_v54, %s1884_s21 }
 0x199   : > { %1232 = vrot.lane.b32.xlu0 %v2084_v51, %s1885_s28 }
 0x19b   : > { %1240 = vrot.lane.b32.xlu1 %v2088_v54, %s1885_s28 }
 0x19d   : > { %571 = vrot.lane.b32.xlu0 %v2114_v0, %s1880_s23 }
 0x19f   : > { %579 = vrot.lane.b32.xlu1 %v2118_v1, %s1880_s23 }
 0x1a1   : > { %762 = vrot.lane.b32.xlu0 %v2114_v0, %s1881_s0 }
 0x1a3   : > { %770 = vrot.lane.b32.xlu1 %v2118_v1, %s1881_s0 }
 0x1a5   : > { %880 = vrot.lane.b32.xlu0 %v2114_v0, %s1882_s26 }
 0x1a7   : > { %888 = vrot.lane.b32.xlu1 %v2118_v1, %s1882_s26 }
 0x1a9   : > { %998 = vrot.lane.b32.xlu0 %v2114_v0, %s1883_s27 }
 0x1ab   : > { %1006 = vrot.lane.b32.xlu1 %v2118_v1, %s1883_s27 }
 0x1ad   : > { %1116 = vrot.lane.b32.xlu0 %v2114_v0, %s1884_s21 }
 0x1af   : > { %1124 = vrot.lane.b32.xlu1 %v2118_v1, %s1884_s21 }
 0x1b1   : > { %1234 = vrot.lane.b32.xlu0 %v2114_v0, %s1885_s28 }
 0x1b3   : > { %1242 = vrot.lane.b32.xlu1 %v2118_v1, %s1885_s28 }
 0x1b5   : > { %1352 = vrot.lane.b32.xlu0 %v2114_v0, %s1886_s25 }
 0x1b7   : > { %1360 = vrot.lane.b32.xlu1 %v2118_v1, %s1886_s25 }
 0x1b9   : > { %573 = vrot.lane.b32.xlu0 %v2146_v8, %s1880_s23 }
 0x1bb   : > { %581 = vrot.lane.b32.xlu1 %v2150_v9, %s1880_s23 }
 0x1bd   : > { %764 = vrot.lane.b32.xlu0 %v2146_v8, %s1881_s0 }
 0x1bf   : > { %772 = vrot.lane.b32.xlu1 %v2150_v9, %s1881_s0 }
 0x1c1   : > { %882 = vrot.lane.b32.xlu0 %v2146_v8, %s1882_s26 }
 0x1c3   : > { %890 = vrot.lane.b32.xlu1 %v2150_v9, %s1882_s26 }
 0x1c5   : > { %1000 = vrot.lane.b32.xlu0 %v2146_v8, %s1883_s27 }
 0x1c7   : > { %1008 = vrot.lane.b32.xlu1 %v2150_v9, %s1883_s27 }
 0x1c9   : > { %1118 = vrot.lane.b32.xlu0 %v2146_v8, %s1884_s21 }
 0x1cb   : > { %1126 = vrot.lane.b32.xlu1 %v2150_v9, %s1884_s21 }
 0x1cd   : > { %1236 = vrot.lane.b32.xlu0 %v2146_v8, %s1885_s28 }
 0x1cf   : > { %1244 = vrot.lane.b32.xlu1 %v2150_v9, %s1885_s28 }
 0x1d1   : > { %1354 = vrot.lane.b32.xlu0 %v2146_v8, %s1886_s25 }
 0x1d3   : > { %1362 = vrot.lane.b32.xlu1 %v2150_v9, %s1886_s25 }
 0x1d5   : > { %1472 = vrot.lane.b32.xlu0 %v2146_v8, %s1887_s13 }
 0x1d7   : > { %1480 = vrot.lane.b32.xlu1 %v2150_v9, %s1887_s13 }
 0x1d9   : > { %575 = vrot.lane.b32.xlu0 %v2186_v17, %s1880_s23 }
 0x1db   : > { %583 = vrot.lane.b32.xlu1 %v2190_v18, %s1880_s23 }
 0x1dd   : > { %1350 = vrot.lane.b32.xlu0 %v2084_v51, %s1886_s25 }
 0x1df   : > { %1358 = vrot.lane.b32.xlu1 %v2088_v54, %s1886_s25 }
 0x1e1   : > { %766 = vrot.lane.b32.xlu0 %v2186_v17, %s1881_s0 }
 0x1e3   : > { %774 = vrot.lane.b32.xlu1 %v2190_v18, %s1881_s0 }
 0x1e5   : > { %884 = vrot.lane.b32.xlu0 %v2186_v17, %s1882_s26 }
 0x1e7   : > { %892 = vrot.lane.b32.xlu1 %v2190_v18, %s1882_s26  ;;  %s1690_s26 = sshll.u32 %s2017_s18, 4 }
 0x1e9   : > { %1002 = vrot.lane.b32.xlu0 %v2186_v17, %s1883_s27 }
 0x1eb   : > { %1010 = vrot.lane.b32.xlu1 %v2190_v18, %s1883_s27  ;;  %s1718_s27 = sshll.u32 %s1960_s12, 8  ;;  %s1888_s12 = smov [#allocation8]  }
 0x1ec   : > { %s1601_s15 = scalar_lea.hbm %s2620_s9, %s1718_s27  ;;  %s1813_s24 = sshll.u32 %s1888_s12, 4  ;;  %s1814_s24 = int_to_ptr.vmem [resolvable:$false] %s1813_s24 }
 0x1ed   : > { %1120 = vrot.lane.b32.xlu0 %v2186_v17, %s1884_s21  ;;  %s1815_s23 = scalar_lea.vmem %s1814_s24, 512 }
 0x1ef   : > { %1128 = vrot.lane.b32.xlu1 %v2190_v18, %s1884_s21  ;;  %s346_s21 = scalar_lea.vmem [#allocation8], %s1690_s26 }
 0x1f1   : > { %1238 = vrot.lane.b32.xlu0 %v2186_v17, %s1885_s28 }
 0x1f3   : > { %1246 = vrot.lane.b32.xlu1 %v2190_v18, %s1885_s28  ;;  %s1603_s28 = sshll.u32 %s346_s21, 4  ;;  %s1604_s28 = int_to_ptr.vmem [resolvable:$true] %s1603_s28 }
 0x1f4   : > { %s1809_s22 = scalar_lea.vmem %s1604_s28, 256  ;;  %p1816_p12 = scmp.lt.s32.totalorder %s1604_s28, %s1814_s24 }
 0x1f5   : > { %1356 = vrot.lane.b32.xlu0 %v2186_v17, %s1886_s25  ;;  %p1810_p5 = scmp.ne.s32.totalorder %s1604_s28, %s1809_s22  ;;  %p1817_p13 = scmp.lt.s32.totalorder %s1815_s23, %s1809_s22 }
 0x1f7   : > { %v570_v21 = vpop.permute.xlu0 %569  ;;  %1364 = vrot.lane.b32.xlu1 %v2190_v18, %s1886_s25  ;;  %p1811_p10 = pnand %p1810_p5, %p2626_p6  ;;  %p1818_p0 = por %p1817_p13, %p1816_p12 }
 0x1f9   : > { %v578_v22 = vpop.permute.xlu1 %577  ;;  %1474 = vrot.lane.b32.xlu0 %v2186_v17, %s1887_s13  ;;  %p1812_p11 = pneg %p1811_p10 }
 0x1fa   : > { %v2232_v23 = vsel %vm587_vm1, %v570_v21, %v578_v22  ;;  %v2236_v24 = vsel %vm587_vm1, %v578_v22, %v570_v21 }
 0x1fb   : > { %v761_v25 = vpop.permute.xlu0 %760  ;;  %1482 = vrot.lane.b32.xlu1 %v2190_v18, %s1887_s13  ;;  %p1819_p1 = pnand %p1818_p0, %p1812_p11 }
 0x1fd   : > { %v769_v26 = vpop.permute.xlu1 %768  ;;  %1470 = vrot.lane.b32.xlu0 %v2114_v0, %s1887_s13 }
 0x1fe   : > { %v2245_v27 = vsel %vm776_vm2, %v769_v26, %v761_v25  ;;  %v2249_v28 = vsel %vm776_vm2, %v761_v25, %v769_v26 }
 0x1ff   : > { %v879_v29 = vpop.permute.xlu0 %878  ;;  %1478 = vrot.lane.b32.xlu1 %v2118_v1, %s1887_s13 }
 0x201   : > { %v887_v30 = vpop.permute.xlu1 %886  ;;  %1468 = vrot.lane.b32.xlu0 %v2084_v51, %s1887_s13 }
 0x202   : > { %v2258_v31 = vsel %vm894_vm3, %v887_v30, %v879_v29  ;;  %v2262_v32 = vsel %vm894_vm3, %v879_v29, %v887_v30 }
 0x203   : > { %v997_v33 = vpop.permute.xlu0 %996  ;;  %1476 = vrot.lane.b32.xlu1 %v2088_v54, %s1887_s13 }
 0x205   : > { %v1005_v34 = vpop.permute.xlu1 %1004 }
 0x206   : > { %v2269_v35 = vsel %vm1012_vm4, %v1005_v34, %v997_v33  ;;  %v2273_v36 = vsel %vm1012_vm4, %v997_v33, %v1005_v34 }
 0x207   : > { %v1115_v37 = vpop.permute.xlu0 %1114 }
 0x209   : > { %v1123_v38 = vpop.permute.xlu1 %1122 }
 0x20a   : > { %v2278_v39 = vsel %vm1130_vm5, %v1115_v37, %v1123_v38  ;;  %v2282_v40 = vsel %vm1130_vm5, %v1123_v38, %v1115_v37 }
 0x20b   : > { %v1233_v41 = vpop.permute.xlu0 %1232 }
 0x20d   : > { %v1241_v42 = vpop.permute.xlu1 %1240 }
 0x20e   : > { %v2287_v43 = vsel %vm1248_vm6, %v1233_v41, %v1241_v42  ;;  %v2291_v44 = vsel %vm1248_vm6, %v1241_v42, %v1233_v41 }
 0x20f   : > { %v572_v45 = vpop.permute.xlu0 %571 }
 0x211   : > { %v580_v46 = vpop.permute.xlu1 %579 }
 0x212   : > { %v589_v47 = vsel %vm587_vm1, %v572_v45, %v580_v46  ;;  %v593_v48 = vsel %vm587_vm1, %v580_v46, %v572_v45 }
 0x213   : > { %v763_v49 = vpop.permute.xlu0 %762 }
 0x215   : > { %v771_v50 = vpop.permute.xlu1 %770 }
 0x216   : > { %v2299_v52 = vsel %vm776_vm2, %v771_v50, %v763_v49  ;;  %v2303_v53 = vsel %vm776_vm2, %v763_v49, %v771_v50 }
 0x217   : > { %v881_v55 = vpop.permute.xlu0 %880 }
 0x219   : > { %v889_v56 = vpop.permute.xlu1 %888 }
 0x21a   : > { %v2307_v57 = vsel %vm894_vm3, %v889_v56, %v881_v55  ;;  %v2311_v58 = vsel %vm894_vm3, %v881_v55, %v889_v56 }
 0x21b   : > { %v999_v59 = vpop.permute.xlu0 %998 }
 0x21d   : > { %v1007_v60 = vpop.permute.xlu1 %1006 }
 0x21e   : > { %v2315_v61 = vsel %vm1012_vm4, %v1007_v60, %v999_v59  ;;  %v2319_v62 = vsel %vm1012_vm4, %v999_v59, %v1007_v60 }
 0x21f   : > { %v1117_v63 = vpop.permute.xlu0 %1116 }
 0x221   : > { %v1125_v2 = vpop.permute.xlu1 %1124 }
 0x222   : > { %v2323_v3 = vsel %vm1130_vm5, %v1117_v63, %v1125_v2  ;;  %v2327_v4 = vsel %vm1130_vm5, %v1125_v2, %v1117_v63 }
 0x223   : > { %v1235_v5 = vpop.permute.xlu0 %1234 }
 0x225   : > { %v1243_v6 = vpop.permute.xlu1 %1242 }
 0x226   : > { %v2331_v7 = vsel %vm1248_vm6, %v1235_v5, %v1243_v6  ;;  %v2335_v10 = vsel %vm1248_vm6, %v1243_v6, %v1235_v5 }
 0x227   : > { %v1353_v12 = vpop.permute.xlu0 %1352 }
 0x229   : > { %v1361_v13 = vpop.permute.xlu1 %1360 }
 0x22a   : > { %v2340_v14 = vsel %vm1366_vm7, %v1353_v12, %v1361_v13  ;;  %v2344_v15 = vsel %vm1366_vm7, %v1361_v13, %v1353_v12  ;;  %v596_v13 = vld [vmem:[%s2619_s8] sm:$0xff] }
 0x22b   : > { %v574_v16 = vpop.permute.xlu0 %573 }
 0x22d   : > { %v582_v21 = vpop.permute.xlu1 %581 }
 0x22e   : > { %v590_v63 = vsel %vm587_vm1, %v574_v16, %v582_v21  ;;  %v594_v5 = vsel %vm587_vm1, %v582_v21, %v574_v16 }
 0x22f   : > { %v765_v22 = vpop.permute.xlu0 %764 }
 0x231   : > { %v773_v25 = vpop.permute.xlu1 %772 }
 0x233   : > { %v2346_v26 = vpop.permute.xlu0 %882 }
 0x235   : > { %v2348_v29 = vpop.permute.xlu1 %890 }
 0x237   : > { %v2350_v30 = vpop.permute.xlu0 %1000 }
 0x239   : > { %v2352_v33 = vpop.permute.xlu1 %1008 }
 0x23b   : > { %v2354_v34 = vpop.permute.xlu0 %1118 }
 0x23d   : > { %v2356_v37 = vpop.permute.xlu1 %1126 }
 0x23f   : > { %v2358_v38 = vpop.permute.xlu0 %1236 }
 0x241   : > { %v2360_v41 = vpop.permute.xlu1 %1244 }
 0x243   : > { %v2362_v42 = vpop.permute.xlu0 %1354 }
 0x245   : > { %v2364_v45 = vpop.permute.xlu1 %1362 }
 0x247   : > { %v2366_v46 = vpop.permute.xlu0 %1472 }
 0x249   : > { %v2368_v49 = vpop.permute.xlu1 %1480 }
 0x24b   : > { %v576_v50 = vpop.permute.xlu0 %575 }
 0x24d   : > { %v584_v55 = vpop.permute.xlu1 %583 }
 0x24e   : > { %v591_v56 = vsel %vm587_vm1, %v576_v50, %v584_v55  ;;  %v595_v59 = vsel %vm587_vm1, %v584_v55, %v576_v50 }
 0x24f   : > { %v2374_v60 = vpop.permute.xlu0 %1350  ;;  %625 = vmatprep.subr.mxu1 %v591_v56  ;;  %v1251_v56 = vsel %vm1248_vm6, %v2358_v38, %v2360_v41 }
 0x250   : > { %626 = vmatpush1.msra.mxu1 %v595_v59 }
 0x251   : > { %627 = vmatprep.subr.mxu1 %v590_v63  ;;  %v2378_v2 = vpop.permute.xlu1 %1358  ;;  %v1369_v63 = vsel %vm1366_vm7, %v2362_v42, %v2364_v45 }
 0x252   : > { %628 = vmatpush1.msra.mxu1 %v594_v5  ;;  %v1487_v5 = vsel %vm1484_vm9, %v2366_v46, %v2368_v49 }
 0x253   : > { %v767_v6 = vpop.permute.xlu0 %766  ;;  %629 = vmatprep.subr.mxu1 %v589_v47  ;;  %v783_v47 = vsel %vm776_vm2, %v773_v25, %v765_v22 }
 0x254   : > { %630 = vmatpush1.msra.mxu1 %v593_v48 }
 0x255   : > { %631 = vmatprep.subr.mxu1 %v2232_v23  ;;  %v775_v12 = vpop.permute.xlu1 %774  ;;  %v779_v23 = vsel %vm776_vm2, %v765_v22, %v773_v25  ;;  %v1019_v22 = vsel %vm1012_vm4, %v2352_v33, %v2350_v30 }
 0x256   : > { %v784_v50 = vsel %vm776_vm2, %v775_v12, %v767_v6  ;;  %632 = vmatpush1.msra.mxu1 %v2236_v24  ;;  %v780_v16 = vsel %vm776_vm2, %v767_v6, %v775_v12 }
 0x257   : > { %v885_v21 = vpop.permute.xlu0 %884  ;;  %713 = vmatprep.subr.mxu1 %v2190_v18  ;;  %814 = vmatprep.subr.mxu0 %v780_v16 }
 0x258   : > { %1696 = vmatmul.mubr.msk.f32.vlgmr.msra.gmra.mxu1 %vm597_vm8, %v596_v13  ;;  %815 = vmatpush1.msra.mxu0 %v784_v50  ;;  %v672_v50 = vld [vmem:[#allocation5] ss:$8 sm:$0x3] }
 0x259   : > { %714 = vmatpush1.msra.mxu1 %v2186_v17  ;;  %816 = vmatprep.subr.mxu0 %v779_v23  ;;  %v893_v24 = vpop.permute.xlu1 %892  ;;  %v1695_v17 = vld [vmem:[%s2619_s8 + $0x20] sm:$0xff] }
 0x25a   : > { %715 = vmatprep.subr.mxu1 %v2150_v9  ;;  %817 = vmatpush1.msra.mxu0 %v783_v47  ;;  %v862_v23 = vld [vmem:[#allocation5 + $0x1] ss:$8 sm:$0x3] }
 0x25b   : > { %716 = vmatpush1.msra.mxu1 %v2146_v8  ;;  %v1003_v18 = vpop.permute.xlu0 %1002  ;;  %818 = vmatprep.subr.mxu0 %v2303_v53  ;;  %v1698_v8 = vld [vmem:[%s2619_s8 + $0x8] sm:$0xff]  ;;  %v901_v53 = vsel %vm894_vm3, %v2348_v29, %v2346_v26 }
 0x25c   : > { %717 = vmatprep.subr.mxu1 %v2118_v1  ;;  %819 = vmatpush1.msra.mxu0 %v2299_v52 }
 0x25d   : > { %718 = vmatpush1.msra.mxu1 %v2114_v0  ;;  %820 = vmatprep.subr.mxu0 %v2249_v28  ;;  %v1011_v48 = vpop.permute.xlu1 %1010  ;;  %v902_v28 = vsel %vm894_vm3, %v893_v24, %v885_v21 }
 0x25e   : > { %719 = vmatprep.subr.mxu1 %v2088_v54  ;;  %753 = vmatprep.mubr.f32.mxu1 %v1879_v11  ;;  %v1016_v1 = vsel %vm1012_vm4, %v1003_v18, %v1011_v48  ;;  %v1020_v0 = vsel %vm1012_vm4, %v1011_v48, %v1003_v18  ;;  %v898_v54 = vsel %vm894_vm3, %v885_v21, %v893_v24  ;;  %v2557_v21 = vsub.s32 1, %v675_v20  ;;  %v980_v48 = vld [vmem:[#allocation5 + $0x2] ss:$8 sm:$0x3] }
 0x25f   : > { %720 = vmatpush1.msra.mxu1 %v2084_v51  ;;  %821 = vmatpush1.msra.mxu0 %v2245_v27  ;;  %v1121_v9 = vpop.permute.xlu0 %1120  ;;  %v897_v51 = vsel %vm894_vm3, %v2346_v26, %v2348_v29  ;;  %v1015_v27 = vsel %vm1012_vm4, %v2350_v30, %v2352_v33  ;;  %v1700_v26 = vld [vmem:[%s2619_s8 + $0x10] sm:$0xff]  ;;  %v1133_v33 = vsel %vm1130_vm5, %v2354_v34, %v2356_v37 }
 0x260   : > { %1697 = vmatmul.mubr.msk.f32.vlgmr.msra.gmra.mxu1 %vm597_vm8, %v1695_v17  ;;  %1699 = vmatmul.mubr.msk.f32.vlgmr.msra.gmra.mxu0 %vm597_vm8, %v1698_v8  ;;  %v871_v19 = vrot.slane %v862_v23, %v2557_v21 }
 0x261   : > { %932 = vmatprep.subr.mxu1 %v898_v54  ;;  %1050 = vmatprep.subr.mxu0 %v1016_v1  ;;  %v1129_v52 = vpop.permute.xlu1 %1128  ;;  %v1098_v54 = vld [vmem:[#allocation5 + $0x3] ss:$8 sm:$0x3] }
 0x262   : > { %933 = vmatpush1.msra.mxu1 %v902_v28  ;;  %1051 = vmatpush1.msra.mxu0 %v1020_v0 }
 0x263   : > { %934 = vmatprep.subr.mxu1 %v897_v51  ;;  %1052 = vmatprep.subr.mxu0 %v1015_v27  ;;  %v1239_v25 = vpop.permute.xlu0 %1238  ;;  %v989_v27 = vrot.slane %v980_v48, %v2557_v21 }
 0x264   : > { %935 = vmatpush1.msra.mxu1 %v901_v53  ;;  %1053 = vmatpush1.msra.mxu0 %v1019_v22 }
 0x265   : > { %936 = vmatprep.subr.mxu1 %v2311_v58  ;;  %1054 = vmatprep.subr.mxu0 %v2319_v62  ;;  %v1247_v55 = vpop.permute.xlu1 %1246  ;;  %v1255_v62 = vsel %vm1248_vm6, %v2360_v41, %v2358_v38 }
 0x266   : > { %937 = vmatpush1.msra.mxu1 %v2307_v57  ;;  %1055 = vmatpush1.msra.mxu0 %v2315_v61  ;;  %v1256_v58 = vsel %vm1248_vm6, %v1247_v55, %v1239_v25  ;;  %v1702_v57 = vld [vmem:[%s2619_s8 + $0x18] sm:$0xff]  ;;  %v1252_v61 = vsel %vm1248_vm6, %v1239_v25, %v1247_v55  ;;  %v1216_v25 = vld [vmem:[#allocation5 + $0x5] ss:$8 sm:$0x3] }
 0x267   : > { %938 = vmatprep.subr.mxu1 %v2262_v32  ;;  %1056 = vmatprep.subr.mxu0 %v2273_v36  ;;  %v1357_v29 = vpop.permute.xlu0 %1356  ;;  %v1138_v32 = vsel %vm1130_vm5, %v1129_v52, %v1121_v9  ;;  %v1134_v36 = vsel %vm1130_vm5, %v1121_v9, %v1129_v52 }
 0x268   : > { %939 = vmatpush1.msra.mxu1 %v2258_v31  ;;  %972 = vmatprep.mubr.f32.mxu1 %v1879_v11 }
 0x269   : > { %1057 = vmatpush1.msra.mxu0 %v2269_v35  ;;  %1701 = vmatmul.mubr.msk.f32.vlgmr.msra.gmra.mxu1 %vm597_vm8, %v1700_v26  ;;  %v1365_v31 = vpop.permute.xlu1 %1364  ;;  %v1137_v35 = vsel %vm1130_vm5, %v2356_v37, %v2354_v34  ;;  %v1704_v34 = vld [vmem:[%s2619_s8 + $0x28] sm:$0xff] }
 0x26a   : > { %1090 = vmatprep.mubr.f32.mxu0 %v1879_v11  ;;  %1168 = vmatprep.subr.mxu1 %v1138_v32  ;;  %v1107_v32 = vrot.slane %v1098_v54, %v2557_v21 }
 0x26b   : > { %1286 = vmatprep.subr.mxu0 %v1256_v58  ;;  %1703 = vmatmul.mubr.msk.f32.vlgmr.msra.gmra.mxu0 %vm597_vm8, %v1702_v57  ;;  %v1475_v30 = vpop.permute.xlu0 %1474 }
 0x26c   : > { %1169 = vmatpush1.msra.mxu1 %v1134_v36  ;;  %1287 = vmatpush1.msra.mxu0 %v1252_v61 }
 0x26d   : > { %1170 = vmatprep.subr.mxu1 %v1137_v35  ;;  %1288 = vmatprep.subr.mxu0 %v1255_v62  ;;  %v1483_v59 = vpop.permute.xlu1 %1482  ;;  %v1334_v62 = vld [vmem:[#allocation5 + $0x6] ss:$8 sm:$0x3] }
 0x26e   : > { %1171 = vmatpush1.msra.mxu1 %v1133_v33  ;;  %1289 = vmatpush1.msra.mxu0 %v1251_v56 }
 0x26f   : > { %1172 = vmatprep.subr.mxu1 %v2327_v4  ;;  %1290 = vmatprep.subr.mxu0 %v2335_v10  ;;  %v1471_v4 = vpop.permute.xlu0 %1470  ;;  %v1488_v10 = vsel %vm1484_vm9, %v1475_v30, %v1483_v59 }
 0x270   : > { %1173 = vmatpush1.msra.mxu1 %v2323_v3  ;;  %1291 = vmatpush1.msra.mxu0 %v2331_v7  ;;  %v1492_v3 = vsel %vm1484_vm9, %v1483_v59, %v1475_v30  ;;  %v1706_v7 = vld [vmem:[%s2619_s8 + $0x30] sm:$0xff]  ;;  %v1225_v59 = vrot.slane %v1216_v25, %v2557_v21 }
 0x271   : > { %1174 = vmatprep.subr.mxu1 %v2282_v40  ;;  %1292 = vmatprep.subr.mxu0 %v2291_v44  ;;  %v1479_v37 = vpop.permute.xlu1 %1478  ;;  %v1370_v40 = vsel %vm1366_vm7, %v1357_v29, %v1365_v31  ;;  %v1491_v44 = vsel %vm1484_vm9, %v2368_v49, %v2366_v46  ;;  %v1708_v46 = vld [vmem:[%s2619_s8 + $0x38] sm:$0xff] }
 0x272   : > { %1175 = vmatpush1.msra.mxu1 %v2278_v39  ;;  %1208 = vmatprep.mubr.f32.mxu1 %v1879_v11  ;;  %v1374_v39 = vsel %vm1366_vm7, %v1365_v31, %v1357_v29  ;;  %v1490_v38 = vsel %vm1484_vm9, %v1479_v37, %v1471_v4  ;;  %v1486_v6 = vsel %vm1484_vm9, %v1471_v4, %v1479_v37 }
 0x273   : > { %1293 = vmatpush1.msra.mxu0 %v2287_v43  ;;  %1705 = vmatmul.mubr.msk.f32.vlgmr.msra.gmra.mxu1 %vm597_vm8, %v1704_v34  ;;  %v1373_v43 = vsel %vm1366_vm7, %v2364_v45, %v2362_v42  ;;  %v1469_v12 = vpop.permute.xlu0 %1468  ;;  %v1371_v42 = vsel %vm1366_vm7, %v2378_v2, %v2374_v60 }
 0x274   : > { %1326 = vmatprep.mubr.f32.mxu0 %v1879_v11  ;;  %1404 = vmatprep.subr.mxu1 %v1374_v39  ;;  %v1452_v39 = vld [vmem:[#allocation5 + $0x7] ss:$8 sm:$0x3] }
 0x275   : > { %1522 = vmatprep.subr.mxu0 %v1492_v3  ;;  %1707 = vmatmul.mubr.msk.f32.vlgmr.msra.gmra.mxu0 %vm597_vm8, %v1706_v7  ;;  %v1477_v41 = vpop.permute.xlu1 %1476 }
 0x276   : > { %1405 = vmatpush1.msra.mxu1 %v1370_v40  ;;  %1523 = vmatpush1.msra.mxu0 %v1488_v10  ;;  %v1489_v13 = vsel %vm1484_vm9, %v1477_v41, %v1469_v12  ;;  %v1485_v45 = vsel %vm1484_vm9, %v1469_v12, %v1477_v41  ;;  %v1570_v41 = vld [vmem:[#allocation5 + $0x10] ss:$8 sm:$0x3] }
 0x277   : > { %1406 = vmatprep.subr.mxu1 %v1373_v43  ;;  %1524 = vmatprep.subr.mxu0 %v1491_v44  ;;  %v1343_v44 = vrot.slane %v1334_v62, %v2557_v21 }
 0x278   : > { %1407 = vmatpush1.msra.mxu1 %v1369_v63  ;;  %1525 = vmatpush1.msra.mxu0 %v1487_v5 }
 0x279   : > { %1408 = vmatprep.subr.mxu1 %v2344_v15  ;;  %1526 = vmatprep.subr.mxu0 %v1490_v38  ;;  %v1367_v15 = vsel %vm1366_vm7, %v2374_v60, %v2378_v2  ;;  %v2555_v2 = vsub.s32 0, %v675_v20  ;;  %v1579_v20 = vrot.slane %v1570_v41, %v2557_v21 }
 0x27a   : > { %1409 = vmatpush1.msra.mxu1 %v2340_v14  ;;  %1527 = vmatpush1.msra.mxu0 %v1486_v6  ;;  %v1710_v14 = vld [vmem:[%s2619_s8 + $0x40] sm:$0xff] }
 0x27b   : > { %1410 = vmatprep.subr.mxu1 %v1371_v42  ;;  %1444 = vmatprep.mubr.f32.mxu1 %v1879_v11  ;;  %v677_v47 = vrot.slane %v672_v50, %v2555_v2  ;;  %v867_v17 = vrot.slane %v862_v23, %v2555_v2  ;;  %v985_v0 = vrot.slane %v980_v48, %v2555_v2 }
 0x27c   : > { %1411 = vmatpush1.msra.mxu1 %v1367_v15  ;;  %1528 = vmatprep.subr.mxu0 %v1489_v13  ;;  %v1103_v58 = vrot.slane %v1098_v54, %v2555_v2  ;;  %v1221_v31 = vrot.slane %v1216_v25, %v2555_v2  ;;  %v1339_v10 = vrot.slane %v1334_v62, %v2555_v2 }
 0x27d   : > { %1709 = vmatmul.mubr.msk.f32.vlgmr.msra.gmra.mxu1 %vm597_vm8, %v1708_v46  ;;  %1529 = vmatpush1.msra.mxu0 %v1485_v45  ;;  %v1457_v12 = vrot.slane %v1452_v39, %v2555_v2  ;;  %v1461_v45 = vrot.slane %v1452_v39, %v2557_v21  ;;  %v1575_v46 = vrot.slane %v1570_v41, %v2555_v2 }
 0x27e   : > { %1562 = vmatprep.mubr.f32.mxu0 %v1879_v11  ;;  %v681_v11 = vrot.slane %v672_v50, %v2557_v21 }
 0x27f   : > { %1711 = vmatmul.mubr.msk.f32.vlgmr.msra.gmra.mxu0 %vm597_vm8, %v1710_v14 }
 0x318   : > { %v667_v49 = vpop.f32.mrf.mxu1 }
 0x319   : > { %v684_v1 = vmul.f32 %v677_v47, %v667_v49 }
 0x31a   : > { %v669_v60 = vpop.f32.mrf.mxu1 }
 0x31b   : > { %v685_v28 = vmul.f32 %v681_v11, %v669_v60 }
 0x320   : > { %v755_v16 = vpop.f32.mrf.mxu1  ;;  %v856_v24 = vpop.f32.mrf.mxu0 }
 0x321   : > { %v756_v52 = vadd.f32 %v755_v16, %v684_v1  ;;  %v874_v51 = vmul.f32 %v867_v17, %v856_v24 }
 0x322   : > { %v757_v18 = vpop.f32.mrf.mxu1  ;;  %v858_v9 = vpop.f32.mrf.mxu0 }
 0x323   : > { %v758_v55 = vadd.f32 %v757_v18, %v685_v28  ;;  %v875_v26 = vmul.f32 %v871_v19, %v858_v9  ;;  %v876_v57 = vadd.f32 %v874_v51, %v756_v52 }
 0x325   : > { %v877_v30 = vadd.f32 %v875_v26, %v758_v55 }
 0x329   : > { %v974_v8 = vpop.f32.mrf.mxu1 }
 0x32a   : > { %v992_v29 = vmul.f32 %v985_v0, %v974_v8 }
 0x32b   : > { %v976_v53 = vpop.f32.mrf.mxu1  ;;  %v1092_v22 = vpop.f32.mrf.mxu0 }
 0x32c   : > { %v993_v61 = vmul.f32 %v989_v27, %v976_v53  ;;  %v994_v33 = vadd.f32 %v992_v29, %v876_v57  ;;  %v1110_v56 = vmul.f32 %v1103_v58, %v1092_v22 }
 0x32d   : > { %v1094_v36 = vpop.f32.mrf.mxu0 }
 0x32e   : > { %v995_v4 = vadd.f32 %v993_v61, %v877_v30  ;;  %v1111_v3 = vmul.f32 %v1107_v32, %v1094_v36  ;;  %v1112_v40 = vadd.f32 %v1110_v56, %v994_v33 }
 0x330   : > { %v1113_v63 = vadd.f32 %v1111_v3, %v995_v4 }
 0x333   : > { %v1210_v35 = vpop.f32.mrf.mxu1 }
 0x334   : > { %v1228_v7 = vmul.f32 %v1221_v31, %v1210_v35 }
 0x335   : > { %v1212_v34 = vpop.f32.mrf.mxu1  ;;  %v1328_v37 = vpop.f32.mrf.mxu0 }
 0x336   : > { %v1229_v43 = vmul.f32 %v1225_v59, %v1212_v34  ;;  %v1230_v5 = vadd.f32 %v1228_v7, %v1112_v40  ;;  %v1346_v6 = vmul.f32 %v1339_v10, %v1328_v37 }
 0x337   : > { %v1330_v38 = vpop.f32.mrf.mxu0 }
 0x338   : > { %v1231_v13 = vadd.f32 %v1229_v43, %v1113_v63  ;;  %v1347_v42 = vmul.f32 %v1343_v44, %v1330_v38  ;;  %v1348_v14 = vadd.f32 %v1346_v6, %v1230_v5 }
 0x33a   : > { %v1349_v16 = vadd.f32 %v1347_v42, %v1231_v13 }
 0x33d   : > { %v1446_v15 = vpop.f32.mrf.mxu1 }
 0x33e   : > { %v1464_v49 = vmul.f32 %v1457_v12, %v1446_v15 }
 0x33f   : > { %v1448_v60 = vpop.f32.mrf.mxu1  ;;  %v1564_v50 = vpop.f32.mrf.mxu0 }
 0x340   : > { %v1466_v23 = vadd.f32 %v1464_v49, %v1348_v14  ;;  %v1465_v47 = vmul.f32 %v1461_v45, %v1448_v60  ;;  %v1582_v24 = vmul.f32 %v1575_v46, %v1564_v50 }
 0x341   : > { %v1566_v18 = vpop.f32.mrf.mxu0 }
 0x342   : > { %v1467_v48 = vadd.f32 %v1465_v47, %v1349_v16  ;;  %v1584_v11 = vadd.f32 %v1582_v24, %v1466_v23  ;;  %v1583_v2 = vmul.f32 %v1579_v20, %v1566_v18 }
 0x344   : > { %1586 = vst [vmem:[%s346_s21] sm:$0xff] %v1584_v11  ;;  %v1585_v17 = vadd.f32 %v1583_v2, %v1467_v48 }
 0x346   : > { %1587 = vst [vmem:[%s346_s21 + $0x8] sm:$0xff] %v1585_v17 }
 0x347   : > { %1822 = shalt.err (!%p1819_p1)
}
 0x348   : > { %s1823_s0 = scalar_lea.hbm %s1601_s15, 256  ;;  %s1827_s27 = scalar_lea.hbm %s2620_s9, 512 }
 0x349   : > { %p1824_p2 = scmp.ne.s32.totalorder %s1601_s15, %s1823_s0  ;;  %p1828_p7 = scmp.lt.s32.totalorder %s1601_s15, %s2620_s9 }
 0x34a   : > { %p1829_p8 = scmp.lt.s32.totalorder %s1827_s27, %s1823_s0 }
 0x34b   : > { %p1825_p3 = pnand %p1824_p2, %p2626_p6 }
 0x34c   : > { %p1830_p5 = por %p1829_p8, %p1828_p7 }
 0x34d   : > { %p1826_p4 = pneg %p1825_p3 }
 0x34f   : > { %p1831_p10 = pnand %p1830_p5, %p1826_p4 }
 0x351   : > { %1834 = shalt.err (!%p1831_p10)
}
 0x352   : > { %1723 = dma.vmem_to_hbm [thread:$0]  (%p2626_p6), %s1604_s28, 256, %s1601_s15, %s1589_s16  }
 0x353 PF: > { %s1615_s13 = sand.u32 1, %s1861_s29   ;;  %p2627_p11 = scmp.ne.s32.totalorder %s2624_s20, 0 }
 0x354   : > { %s1616_s22 = scalar_lea.sflag [#allocation7], %s1615_s13 }
 0x355   : > { %p1730_p12 = pnand %p1683_p9, %p2627_p11 }
 0x357   : > { %p1731_p13 = pneg %p1730_p12 }
 0x359   : > { %1856 = dma.done.wait (%p1731_p13), %s1616_s22, 256  }
 0x35a   : > { %1858 = vsyncadd (%p1731_p13), %s1616_s22, 4294967040  ;;  %p21_p0 = scmp.ge.s32.totalorder %s1964_s14, 4   ;;  %s2628_s29 = smov %s1865_s30 }
 0x35b   : > { %s2629_s30 = smov %s1869_s10  ;;  %s2630_s10 = smov %s1976_s17 }
 0x35c   : > { %s2631_s11 = smov %s1964_s14  ;;  %23 = sbr.rel (!%p21_p0) target bundleno = 4 (0x4), region = 135 }
 0x361   :  { %1621 = vsyncpa [#allocation6], 1 }
 0x362   :  { %1623 = vsyncpa [#allocation6 + $0x1], 1 }
 0x363   :  { %1624 = vsyncpa [#allocation7], 1 }
 0x364   :  { %1626 = vsyncpa [#allocation7 + $0x1], 1 }

</bundles_post_ra>
